<compile_context>
chip_gen: v6e
topology: v6e:2x2x1
jax: 0.10.0
libtpu: 0.0.40
codegen_flags: <defaults>
</compile_context>

<pallas_src>
import jax
import jax.numpy as jnp
from jax.experimental import pallas as pl
from jax.experimental.pallas import tpu as pltpu

_LANES = 128
_ACC_ROWS = 8          # accumulator rows: one f32 vreg
_INNER_ROWS = 1024     # strip-mine chunk inside a tile (caps live vregs/VMEM)


def _round_up(x: int, m: int) -> int:
    return ((x + m - 1) // m) * m


def _sublane_multiple(dtype) -> int:
    # Native TPU tiling: (8,128) for 32-bit, (16,128) 16-bit, (32,128) 8-bit.
    return max(_ACC_ROWS, 32 // max(jnp.dtype(dtype).itemsize, 1))


def _chip_hints():
    """Best-effort (n_parallel_slices, tile_bytes_per_input, vmem_limit_bytes).

    Defaults are safe on every TPU generation; v7x-class chips (2 TensorCores,
    ~3.2 TB/s HBM, 64 MiB VMEM) get bigger tiles and a 2-way parallel split.
    """
    n_par, tile_bytes, vmem_limit = 1, 2 << 20, 32 << 20
    try:
        kind = jax.devices()[0].device_kind.lower()
        if "7" in kind:  # e.g. "TPU7x": 2 TensorCores per chip, faster HBM
            n_par, tile_bytes, vmem_limit = 2, 4 << 20, 48 << 20
    except Exception:
        pass
    return n_par, tile_bytes, vmem_limit


def _make_rmsle_kernel(*, tile_rows, inner_rows, n_steps, valid_rows,
                       needs_mask, compute_dtype):
    n_inner = tile_rows // inner_rows
    assert tile_rows % inner_rows == 0 and inner_rows % _ACC_ROWS == 0

    def chunk_sum(base_row, r0, pred_ref, act_ref):
        p = pred_ref[pl.ds(r0, inner_rows), :].astype(compute_dtype)
        a = act_ref[pl.ds(r0, inner_rows), :].astype(compute_dtype)
        # Logs go to the EUP (its own bundle slot); subtract/square/accumulate
        # stay in f32 for accuracy.
        d = (jnp.log(p + 1.0).astype(jnp.float32)
             - jnp.log(a + 1.0).astype(jnp.float32))
        sq = d * d
        if needs_mask:
            # Zero contributions from rows past the real array: the partial
            # last tile's out-of-bounds sublanes hold unspecified data, and a
            # select (not a multiply) keeps any NaN there from propagating.
            rid = base_row + r0 + jax.lax.broadcasted_iota(jnp.int32, sq.shape, 0)
            sq = jnp.where(rid < valid_rows, sq, 0.0)
        # Fold the chunk into one (8,128) vreg: leading-axis sum = pure VPU adds.
        return jnp.sum(sq.reshape(-1, _ACC_ROWS, _LANES), axis=0)

    def kernel(pred_ref, act_ref, o_ref):
        step = pl.program_id(1)

        @pl.when(step == 0)
        def _init():
            o_ref[...] = jnp.zeros_like(o_ref)

        # Logical (unclamped) first row of this tile, used by the row mask.
        base_row = (pl.program_id(0) * n_steps + step) * tile_rows

        if n_inner == 1:
            o_ref[...] += chunk_sum(base_row, 0, pred_ref, act_ref)
        else:
            def body(i, acc):
                r0 = pl.multiple_of(i * inner_rows, inner_rows)
                return acc + chunk_sum(base_row, r0, pred_ref, act_ref)
            o_ref[...] += jax.lax.fori_loop(
                0, n_inner, body, jnp.zeros((_ACC_ROWS, _LANES), jnp.float32))

    return kernel


def rmsle_loss(pred: jax.Array, actual: jax.Array, *,
               low_precision_log: bool = False) -> jax.Array:
    """RMSLE loss = sqrt(mean((log(pred+1) - log(actual+1))^2)). Scalar f32."""
    assert pred.shape == actual.shape, "pred/actual must have matching shapes"
    n = pred.size
    assert n > 0

    pred_f = pred.reshape(-1)
    act_f = actual.reshape(-1)

    sub = max(_sublane_multiple(pred.dtype), _sublane_multiple(actual.dtype))
    max_itemsize = max(jnp.dtype(pred.dtype).itemsize,
                       jnp.dtype(actual.dtype).itemsize)

    n_par_hint, tile_bytes, vmem_limit = _chip_hints()
    max_tile_rows = max(tile_bytes // (_LANES * max_itemsize), _INNER_ROWS)

    rows = pl.cdiv(n, _LANES)          # lane-dense rows actually holding data
    lane_pad = rows * _LANES - n       # < 128 trailing elements

    if rows <= max_tile_rows:
        # Single tile per (sole) parallel slice; pad the small slab so the
        # block exactly matches the array -> no masking, no partial blocks.
        n_par, n_steps = 1, 1
        tile_rows = _round_up(rows, sub)
        if tile_rows > _INNER_ROWS:
            tile_rows = _round_up(tile_rows, _INNER_ROWS)
        row_pad = tile_rows - rows
    else:
        # Large input: zero copy -- the partial last tile is handled by the
        # in-kernel row mask instead of padding the whole array in HBM.
        n_par = n_par_hint
        tile_rows = max_tile_rows
        n_steps = pl.cdiv(rows, n_par * tile_rows)
        row_pad = 0

    total_pad = row_pad * _LANES + lane_pad
    if total_pad:
        # TODO(synk): for n % 128 != 0 this still copies both inputs once; a
        # manual-DMA (memory_space=pl.ANY) path or a plain-JAX lane tail would
        # avoid it.  Large lane-aligned inputs take the zero-copy path above.
        pred_f = jnp.pad(pred_f, (0, total_pad))
        act_f = jnp.pad(act_f, (0, total_pad))

    arr_rows = rows + row_pad
    pred2 = pred_f.reshape(arr_rows, _LANES)
    act2 = act_f.reshape(arr_rows, _LANES)

    last_block = pl.cdiv(arr_rows, tile_rows) - 1
    needs_mask = (n_par * n_steps * tile_rows) != arr_rows
    inner_rows = tile_rows if tile_rows <= _INNER_ROWS else _INNER_ROWS

    if (low_precision_log and pred.dtype == jnp.bfloat16
            and actual.dtype == jnp.bfloat16):
        # Halves EUP pushes (the binding slot for bf16 inputs on v6e/v7x) at
        # the cost of a few bits of log accuracy.  v5e has no bf16 EUP.
        compute_dtype = jnp.bfloat16
    else:
        compute_dtype = jnp.float32

    kernel = _make_rmsle_kernel(
        tile_rows=tile_rows, inner_rows=inner_rows, n_steps=n_steps,
        valid_rows=arr_rows, needs_mask=needs_mask, compute_dtype=compute_dtype)

    # Clamp the block index so mapped tiles never start past the array; any
    # logically out-of-range rows are zeroed by the in-kernel mask.
    def in_index_map(c, s):
        return (jnp.minimum(c * n_steps + s, last_block), 0)

    in_spec = pl.BlockSpec((tile_rows, _LANES), in_index_map)
    out_spec = pl.BlockSpec((_ACC_ROWS, _LANES), lambda c, s: (c, 0))

    cost = pl.CostEstimate(
        flops=6 * n,
        transcendentals=2 * n,
        bytes_accessed=n * (jnp.dtype(pred.dtype).itemsize
                            + jnp.dtype(actual.dtype).itemsize)
        + n_par * _ACC_ROWS * _LANES * 4,
    )

    partials = pl.pallas_call(
        kernel,
        out_shape=jax.ShapeDtypeStruct((n_par * _ACC_ROWS, _LANES), jnp.float32),
        grid=(n_par, n_steps),
        in_specs=[in_spec, in_spec],
        out_specs=out_spec,
        compiler_params=pltpu.CompilerParams(
            # TODO(synk): on v7x, verify in the profile that the leading
            # "parallel" axis really shards across both TensorCores; if one
            # core idles, switch that axis to pltpu.CORE_PARALLEL.
            dimension_semantics=("parallel", "arbitrary"),
            vmem_limit_bytes=vmem_limit,
        ),
        cost_estimate=cost,
    )(pred2, act2)

    # Tiny (n_par*8, 128) cross-lane reduce + sqrt in plain JAX.
    return jnp.sqrt(jnp.sum(partials) / n)


if __name__ == "__main__":
    key = jax.random.PRNGKey(0)
    k1, k2, k3, k4 = jax.random.split(key, 4)

    # Spec-sized check: small NCHW-like tensors (loss reduces over all elements).
    shape = (2, 4, 16, 16)
    pred = jax.random.uniform(k1, shape, jnp.float32, minval=0.1, maxval=5.0)
    actual = jax.random.uniform(k2, shape, jnp.float32, minval=0.1, maxval=5.0)
    loss = rmsle_loss(pred, actual)
    jax.block_until_ready(loss)
    ref = jnp.sqrt(jnp.mean((jnp.log(pred + 1.0) - jnp.log(actual + 1.0)) ** 2))
    assert jnp.allclose(loss, ref, rtol=1e-5, atol=1e-6), (loss, ref)

    # Ragged multi-tile check: exercises the masked partial tile, the clamped
    # index map and the strip-mined fori_loop body.
    shape_big = (1030, 1030)
    pred_b = jax.random.uniform(k3, shape_big, jnp.float32, minval=0.1, maxval=5.0)
    actual_b = jax.random.uniform(k4, shape_big, jnp.float32, minval=0.1, maxval=5.0)
    loss_b = rmsle_loss(pred_b, actual_b)
    jax.block_until_ready(loss_b)
    ref_b = jnp.sqrt(jnp.mean((jnp.log(pred_b + 1.0) - jnp.log(actual_b + 1.0)) ** 2))
    assert jnp.allclose(loss_b, ref_b, rtol=2e-4, atol=1e-6), (loss_b, ref_b)

    print("KERNEL_OK")
</pallas_src>

<mosaic_0001>
module attributes {stable_mosaic.version = 11 : i64} {
  func.func @kernel(%arg0: i32, %arg1: i32, %arg2: memref<16x128xf32, #tpu.memory_space<vmem>>, %arg3: memref<16x128xf32, #tpu.memory_space<vmem>>, %arg4: memref<8x128xf32, #tpu.memory_space<vmem>>) attributes {dimension_semantics = [#tpu.dimension_semantics<parallel>, #tpu.dimension_semantics<arbitrary>], iteration_bounds = array<i64: 1, 1>, scalar_prefetch = 0 : i64, scratch_operands = 0 : i64, tpu.core_type = #tpu.core_type<tc>, window_params = [{transform_indices = @transform_0, window_bounds = array<i64: 16, 128>}, {transform_indices = @transform_1, window_bounds = array<i64: 16, 128>}, {transform_indices = @transform_2, window_bounds = array<i64: 8, 128>}]} {
    %c0_i32 = arith.constant 0 : i32
    %0 = arith.cmpi eq, %arg1, %c0_i32 : i32
    %1 = arith.extui %0 : i1 to i32
    %c0_i32_0 = arith.constant 0 : i32
    %2 = arith.cmpi ne, %1, %c0_i32_0 : i32
    scf.if %2 {
      %cst_10 = arith.constant 0.000000e+00 : f32
      %18 = vector.broadcast %cst_10 : f32 to vector<8x128xf32>
      %c0_11 = arith.constant 0 : index
      %c0_12 = arith.constant 0 : index
      %19 = vector.load %arg4[%c0_11, %c0_12] : memref<8x128xf32, #tpu.memory_space<vmem>>, vector<8x128xf32>
      tpu.vector_store %arg4[%c0_11, %c0_12], %18 {strides = array<i32>} : memref<8x128xf32, #tpu.memory_space<vmem>>, vector<8x128xf32>,
    } else {
    }
    %c0 = arith.constant 0 : index
    %c0_1 = arith.constant 0 : index
    %3 = vector.load %arg4[%c0, %c0_1] : memref<8x128xf32, #tpu.memory_space<vmem>>, vector<8x128xf32>
    %c0_2 = arith.constant 0 : index
    %c0_3 = arith.constant 0 : index
    %4 = vector.load %arg2[%c0_2, %c0_3] : memref<16x128xf32, #tpu.memory_space<vmem>>, vector<16x128xf32>
    %c0_4 = arith.constant 0 : index
    %c0_5 = arith.constant 0 : index
    %5 = vector.load %arg3[%c0_4, %c0_5] : memref<16x128xf32, #tpu.memory_space<vmem>>, vector<16x128xf32>
    %cst = arith.constant 1.000000e+00 : f32
    %6 = vector.broadcast %cst : f32 to vector<16x128xf32>
    %7 = arith.addf %4, %6 : vector<16x128xf32>
    %8 = math.log %7 : vector<16x128xf32>
    %cst_6 = arith.constant 1.000000e+00 : f32
    %9 = vector.broadcast %cst_6 : f32 to vector<16x128xf32>
    %10 = arith.addf %5, %9 : vector<16x128xf32>
    %11 = math.log %10 : vector<16x128xf32>
    %12 = arith.subf %8, %11 : vector<16x128xf32>
    %13 = arith.mulf %12, %12 : vector<16x128xf32>
    %14 = vector.shape_cast %13 : vector<16x128xf32> to vector<2x8x128xf32>
    %cst_7 = arith.constant dense<0.000000e+00> : vector<8x128xf32>
    %15 = vector.multi_reduction <add>, %14, %cst_7 [0] : vector<2x8x128xf32> to vector<8x128xf32>
    %16 = arith.addf %3, %15 : vector<8x128xf32>
    %c0_8 = arith.constant 0 : index
    %c0_9 = arith.constant 0 : index
    %17 = vector.load %arg4[%c0_8, %c0_9] : memref<8x128xf32, #tpu.memory_space<vmem>>, vector<8x128xf32>
    tpu.vector_store %arg4[%c0_8, %c0_9], %16 {strides = array<i32>} : memref<8x128xf32, #tpu.memory_space<vmem>>, vector<8x128xf32>,
    return
  }
  func.func @transform_0(%arg0: i32, %arg1: i32) -> (i32, i32) {
    %c1_i32 = arith.constant 1 : i32
    %0 = arith.muli %arg0, %c1_i32 : i32
    %1 = arith.addi %0, %arg1 : i32
    %c0_i32 = arith.constant 0 : i32
    %2 = arith.minsi %1, %c0_i32 : i32
    %c0_i32_0 = arith.constant 0 : i32
    %c0_i32_1 = arith.constant 0 : i32
    return %2, %c0_i32_0 : i32, i32
  }
  func.func @transform_1(%arg0: i32, %arg1: i32) -> (i32, i32) {
    %c1_i32 = arith.constant 1 : i32
    %0 = arith.muli %arg0, %c1_i32 : i32
    %1 = arith.addi %0, %arg1 : i32
    %c0_i32 = arith.constant 0 : i32
    %2 = arith.minsi %1, %c0_i32 : i32
    %c0_i32_0 = arith.constant 0 : i32
    %c0_i32_1 = arith.constant 0 : i32
    return %2, %c0_i32_0 : i32, i32
  }
  func.func @transform_2(%arg0: i32, %arg1: i32) -> (i32, i32) {
    %c0_i32 = arith.constant 0 : i32
    %c0_i32_0 = arith.constant 0 : i32
    return %arg0, %c0_i32 : i32, i32
  }
}

</mosaic_0001>

<bundles_post_ra>
// kernel: tpu_custom_call.1
= control target key start
LH: loop header
LB: loop body
LE: loop exit
PB: predicated region body
PF: predicated region fallthrough
CT: control target
= control target key end

     0   :  { %7 = vsyncpa [#allocation3], 0  ;;  %s218_s0 = inlined_call_operand.hbm [shape: f32[16,128], index: 0, kind: input, shape index: {}]   ;;  %s219_s1 = inlined_call_operand.hbm [shape: f32[16,128], index: 1, kind: input, shape index: {}]   ;;  %s220_s2 = inlined_call_operand.hbm [shape: f32[8,128], index: 2, kind: output, shape index: {}]  }
   0x1   :  { %8 = vsyncpa [#allocation6], 0 }
   0x2   :  { %9 = vsyncpa [#allocation4], 0  ;;  %s189_s9 = smov [#allocation2]  }
   0x3   :  { %s21_s10 = sshll.u32 %s189_s9, 4  ;;  %s22_s10 = int_to_ptr.vmem [resolvable:$true] %s21_s10 }
   0x4   :  { %s131_s11 = scalar_lea.vmem %s22_s10, 256  ;;  %p136_p1 = scmp.lt.s32.totalorder %s22_s10, %s22_s10 }
   0x5   :  { %p132_p0 = scmp.ne.s32.totalorder %s22_s10, %s131_s11  ;;  %p137_p2 = scmp.lt.s32.totalorder %s131_s11, %s131_s11 }
   0x7   :  { %p138_p3 = por %p137_p2, %p136_p1 }
   0x9   :  { %p139_p4 = pnand %p138_p3, %p132_p0 }
   0xb   :  { %142 = shalt.err (!%p139_p4)
}
   0xc   :  { %s190_s12 = smov 128   ;;  %s191_s13 = smov 8  }
   0xd   :  { %27 = dma.hbm_to_vmem [thread:$0]  %s218_s0, 256, %s22_s10, [#allocation3], %s190_s12, %s190_s12, %s191_s13  }
   0xe   :  { %s192_s16 = smov [#allocation5]  }
   0xf   :  { %s39_s17 = sshll.u32 %s192_s16, 4  ;;  %s40_s17 = int_to_ptr.vmem [resolvable:$true] %s39_s17 }
  0x10   :  { %s151_s18 = scalar_lea.vmem %s40_s17, 256  ;;  %p156_p6 = scmp.lt.s32.totalorder %s40_s17, %s40_s17 }
  0x11   :  { %p152_p5 = scmp.ne.s32.totalorder %s40_s17, %s151_s18  ;;  %p157_p7 = scmp.lt.s32.totalorder %s151_s18, %s151_s18 }
  0x13   :  { %p158_p8 = por %p157_p7, %p156_p6 }
  0x15   :  { %p159_p9 = pnand %p158_p8, %p152_p5 }
  0x17   :  { %162 = shalt.err (!%p159_p9)
}
  0x18   :  { %45 = dma.hbm_to_vmem [thread:$0]  %s219_s1, 256, %s40_s17, [#allocation6], %s190_s12, %s190_s12, %s191_s13  }
  0x19   :  { %183 = dma.done.wait [#allocation3], 256  }
  0x1a   :  { %184 = vsyncadd [#allocation3], 4294967040 }
  0x1b   :  { %185 = dma.done.wait [#allocation6], 256  }
  0x1c   :  { %186 = vsyncadd [#allocation6], 4294967040  ;;  %v66_v0 = vld [vmem:[#allocation2] sm:$0xff]  ;;  %v67_v1 = vld [vmem:[#allocation2 + $0x8] sm:$0xff]  ;;  %s193_s0 = smov [#allocation7]  }
  0x1d   :  { %v68_v2 = vld [vmem:[#allocation5] sm:$0xff]  ;;  %v69_v3 = vld [vmem:[#allocation5 + $0x8] sm:$0xff]  ;;  %v70_v4 = vadd.f32 1.0, %v66_v0  ;;  %v71_v5 = vadd.f32 1.0, %v67_v1  ;;  %s95_s1 = sshll.u32 %s193_s0, 4  ;;  %s96_s1 = int_to_ptr.vmem [resolvable:$true] %s95_s1 }
  0x1e   :  { %v76_v6 = vadd.f32 1.0, %v68_v2  ;;  %v77_v7 = vadd.f32 1.0, %v69_v3  ;;  %s163_s21 = scalar_lea.vmem %s96_s1, 128  ;;  %p168_p11 = scmp.lt.s32.totalorder %s96_s1, %s96_s1 }
  0x1f   :  { %115 = vlog2.f32 %v70_v4  ;;  %p164_p10 = scmp.ne.s32.totalorder %s96_s1, %s163_s21  ;;  %p169_p12 = scmp.lt.s32.totalorder %s163_s21, %s163_s21 }
  0x20   :  { %117 = vlog2.f32 %v71_v5 }
  0x21   :  { %119 = vlog2.f32 %v76_v6  ;;  %p170_p13 = por %p169_p12, %p168_p11 }
  0x22   :  { %121 = vlog2.f32 %v77_v7 }
  0x23   :  { %p171_p0 = pnand %p170_p13, %p164_p10 }
  0x2c   :  { %v116_v8 = vpop.eup %115 }
  0x2d   :  { %v118_v9 = vpop.eup %117  ;;  %v73_v10 = vmul.f32 0.6931472, %v116_v8 }
  0x2e   :  { %v120_v11 = vpop.eup %119  ;;  %v75_v12 = vmul.f32 0.6931472, %v118_v9 }
  0x2f   :  { %v122_v13 = vpop.eup %121  ;;  %v79_v14 = vmul.f32 0.6931472, %v120_v11 }
  0x30   :  { %v81_v15 = vmul.f32 0.6931472, %v122_v13 }
  0x31   :  { %v82_v16 = vsub.f32 %v73_v10, %v79_v14 }
  0x32   :  { %v83_v17 = vsub.f32 %v75_v12, %v81_v15 }
  0x33   :  { %v84_v18 = vmul.f32 %v82_v16, %v82_v16 }
  0x34   :  { %v85_v19 = vmul.f32 %v83_v17, %v83_v17 }
  0x36   :  { %v86_v20 = vadd.f32 %v85_v19, %v84_v18 }
  0x38   :  { %88 = vst [vmem:[#allocation7] sm:$0xff] %v86_v20 }
  0x39   :  { %174 = shalt.err (!%p171_p0)
}
  0x3a   :  { %98 = dma.vmem_to_hbm [thread:$0]  %s96_s1, 128, %s220_s2, [#allocation4]  }
  0x3b   :  { %187 = dma.done.wait [#allocation4], 128  }
  0x3c   :  { %188 = vsyncadd [#allocation4], 4294967168 }
  0x3d   :  { %102 = vsyncpa [#allocation3], 1 }
  0x3e   :  { %103 = vsyncpa [#allocation6], 1 }
  0x3f   :  { %104 = vsyncpa [#allocation4], 1 }

</bundles_post_ra>
